<compile_context>
chip_gen: v7x
topology: tpu7x:2x2x1
jax: 0.10.0
libtpu: 0.0.40
codegen_flags: <defaults>
</compile_context>

<pallas_src>
import jax
import jax.numpy as jnp
from jax.experimental import pallas as pl
from jax.experimental.pallas import tpu as pltpu


def _round_up(v, m):
    return pl.cdiv(v, m) * m


def _pad2d(a, rows, cols):
    pr, pc = rows - a.shape[0], cols - a.shape[1]
    if pr == 0 and pc == 0:
        return a
    return jnp.pad(a, ((0, pr), (0, pc)))


def _make_kernel(matmul_dtype, apply_relu):
    def kernel(x_ref, w_ref, m_ref, b_ref, o_ref, acc_ref):
        k = pl.program_id(2)

        @pl.when(k == 0)
        def _():
            acc_ref[...] = jnp.zeros_like(acc_ref)

        # Apply the pruning mask on the (tk, tn) tile.  Mask values are exactly
        # 0/1, so doing the multiply in bf16 (fast path) or upcasting the bf16
        # mask to f32 (exact path) is bit-exact w.r.t. W * mask.
        x = x_ref[...]
        w = w_ref[...]
        m = m_ref[...]
        if matmul_dtype is not None:
            # Cast weights first so the mask-apply is a single bf16 VPU mul.
            w_masked = w.astype(matmul_dtype) * m.astype(matmul_dtype)
            x = x.astype(matmul_dtype)
        else:
            w_masked = w * m.astype(w.dtype)

        acc_ref[...] += jnp.dot(x, w_masked, preferred_element_type=jnp.float32)

        @pl.when(k == pl.num_programs(2) - 1)
        def _():
            out = acc_ref[...] + b_ref[...].astype(jnp.float32)
            if apply_relu:
                out = jnp.maximum(out, 0.0)
            o_ref[...] = out.astype(o_ref.dtype)

    return kernel


def masked_linear(x, weights, mask, bias=None, *, activation="relu",
                  tm=256, tn=256, tk=512, matmul_dtype=None):
    """y = act(x @ (weights * mask) + bias).

    x: (M, K), weights/mask: (K, N), bias: (N,) or None -> (M, N)
    """
    M, K = x.shape
    Kw, N = weights.shape
    assert K == Kw and mask.shape == weights.shape

    # Sublane alignment for the x / out row dimension depends on dtype
    # (f32 -> 8, bf16 -> 16, int8 -> 32); lanes always align to 128.
    sub = 8 * 4 // jnp.dtype(x.dtype).itemsize

    # Clamp tiles to the (padded) problem size, keep (sub, 128) alignment.
    tm = max(sub, min(_round_up(tm, sub), _round_up(M, sub)))
    tk = max(128, min(_round_up(tk, 128), _round_up(K, 128)))
    tn = max(128, min(_round_up(tn, 128), _round_up(N, 128)))

    Mp, Kp, Np = _round_up(M, tm), _round_up(K, tk), _round_up(N, tn)

    # Zero-pad remainders: padded K rows/cols contribute 0 to the dot, padded
    # M rows / N cols are sliced off at the end -> exact.
    x_p = _pad2d(x, Mp, Kp)
    w_p = _pad2d(weights, Kp, Np)
    m_p = _pad2d(mask, Kp, Np).astype(jnp.bfloat16)   # 0/1 exact; half the HBM bytes
    if bias is None:
        bias = jnp.zeros((N,), x.dtype)
    b_p = _pad2d(bias.reshape(1, N), 1, Np)

    grid = (Mp // tm, Np // tn, Kp // tk)

    # VMEM budget: double-buffered input/output tiles + f32 accumulator.
    it = jnp.dtype(x.dtype).itemsize
    est = 2 * (tm * tk * it                                    # x tile
               + tk * tn * jnp.dtype(weights.dtype).itemsize   # weight tile
               + tk * tn * 2                                   # bf16 mask tile
               + tn * 4                                        # bias tile
               + tm * tn * it)                                 # out tile
    est += tm * tn * 4                                         # accumulator scratch
    vmem_limit = int(min(56 * 2**20, max(32 * 2**20, 2 * est)))  # <64 MiB for v7x

    kernel = _make_kernel(matmul_dtype, apply_relu=(activation == "relu"))

    out = pl.pallas_call(
        kernel,
        out_shape=jax.ShapeDtypeStruct((Mp, Np), x.dtype),
        grid_spec=pltpu.PrefetchScalarGridSpec(
            num_scalar_prefetch=0,
            grid=grid,
            in_specs=[
                pl.BlockSpec((tm, tk), lambda i, j, k: (i, k)),   # x tile
                pl.BlockSpec((tk, tn), lambda i, j, k: (k, j)),   # weight tile
                pl.BlockSpec((tk, tn), lambda i, j, k: (k, j)),   # mask tile (bf16)
                pl.BlockSpec((1, tn), lambda i, j, k: (0, j)),    # bias tile
            ],
            out_specs=pl.BlockSpec((tm, tn), lambda i, j, k: (i, j)),
            scratch_shapes=[pltpu.VMEM((tm, tn), jnp.float32)],
        ),
        compiler_params=pltpu.CompilerParams(
            dimension_semantics=("parallel", "parallel", "arbitrary"),
            vmem_limit_bytes=vmem_limit,
        ),
    )(x_p, w_p, m_p, b_p)

    return out[:M, :N]


def xavier_uniform(key, shape, dtype=jnp.float32):
    fan_in, fan_out = shape
    bound = (6.0 / (fan_in + fan_out)) ** 0.5
    return jax.random.uniform(key, shape, dtype, minval=-bound, maxval=bound)


if __name__ == "__main__":
    key = jax.random.PRNGKey(0)
    k_x, k_w, k_m, k_b = jax.random.split(key, 4)

    # Small, but exercises M-remainder padding (12 -> 16), a multi-step K
    # reduction (K=288, tk=128 -> 3 steps incl. zero-padded tail) and
    # multi-tile N (384 / 128 = 3) with the small explicit tiles below.
    M, K, N = 12, 288, 384

    x = jax.random.normal(k_x, (M, K), jnp.float32)
    weights = xavier_uniform(k_w, (K, N))
    mask = (jax.random.uniform(k_m, (K, N)) > 0.5).astype(jnp.float32)  # pruning mask
    bias = 0.1 * jax.random.normal(k_b, (N,), jnp.float32)

    # Plain-JAX reference (full-precision matmul), matching the PyTorch module.
    ref = jnp.maximum(
        jnp.dot(x, weights * mask, precision=jax.lax.Precision.HIGHEST) + bias, 0.0)

    # f32 path, small tiles (exercises the multi-step K reduction).
    out = masked_linear(x, weights, mask, bias, tm=16, tn=128, tk=128)
    out = jax.block_until_ready(out)
    assert out.shape == (M, N)
    assert jnp.allclose(out, ref, atol=1e-3, rtol=1e-3), "f32 kernel mismatch vs reference"

    # f32 path, default (clamped) tiles — exercises the tile-clamping logic.
    out_def = masked_linear(x, weights, mask, bias)
    out_def = jax.block_until_ready(out_def)
    assert jnp.allclose(out_def, ref, atol=1e-3, rtol=1e-3), "default-tile kernel mismatch"

    # bf16-MXU-operand path (v5e/v6e fast path); accumulation stays f32.
    out_bf16 = masked_linear(x, weights, mask, bias, tm=16, tn=128, tk=128,
                             matmul_dtype=jnp.bfloat16)
    out_bf16 = jax.block_until_ready(out_bf16)
    assert jnp.allclose(out_bf16, ref, atol=5e-2, rtol=5e-2), "bf16 kernel mismatch vs reference"

    print("KERNEL_OK")
</pallas_src>

<mosaic_0001>
module attributes {stable_mosaic.version = 11 : i64} {
  func.func @kernel(%arg0: i32, %arg1: i32, %arg2: i32, %arg3: memref<16x128xf32, #tpu.memory_space<vmem>>, %arg4: memref<128x128xf32, #tpu.memory_space<vmem>>, %arg5: memref<128x128xbf16, #tpu.memory_space<vmem>>, %arg6: memref<1x128xf32, #tpu.memory_space<vmem>>, %arg7: memref<16x128xf32, #tpu.memory_space<vmem>>, %arg8: memref<16x128xf32, #tpu.memory_space<vmem>>) attributes {dimension_semantics = [#tpu.dimension_semantics<parallel>, #tpu.dimension_semantics<parallel>, #tpu.dimension_semantics<arbitrary>], iteration_bounds = array<i64: 1, 3, 3>, scalar_prefetch = 0 : i64, scratch_operands = 1 : i64, tpu.core_type = #tpu.core_type<tc>, window_params = [{transform_indices = @transform_0, window_bounds = array<i64: 16, 128>}, {transform_indices = @transform_1, window_bounds = array<i64: 128, 128>}, {transform_indices = @transform_2, window_bounds = array<i64: 128, 128>}, {transform_indices = @transform_3, window_bounds = array<i64: 1, 128>}, {transform_indices = @transform_4, window_bounds = array<i64: 16, 128>}]} {
    %c0_i32 = arith.constant 0 : i32
    %0 = arith.cmpi eq, %arg2, %c0_i32 : i32
    %1 = arith.extui %0 : i1 to i32
    %c0_i32_0 = arith.constant 0 : i32
    %2 = arith.cmpi ne, %1, %c0_i32_0 : i32
    scf.if %2 {
      %cst_11 = arith.constant 0.000000e+00 : f32
      %15 = vector.broadcast %cst_11 : f32 to vector<16x128xf32>
      %c0_12 = arith.constant 0 : index
      %c0_13 = arith.constant 0 : index
      %16 = vector.load %arg8[%c0_12, %c0_13] : memref<16x128xf32, #tpu.memory_space<vmem>>, vector<16x128xf32>
      tpu.vector_store %arg8[%c0_12, %c0_13], %15 {strides = array<i32>} : memref<16x128xf32, #tpu.memory_space<vmem>>, vector<16x128xf32>,
    } else {
    }
    %c0 = arith.constant 0 : index
    %c0_1 = arith.constant 0 : index
    %3 = vector.load %arg3[%c0, %c0_1] : memref<16x128xf32, #tpu.memory_space<vmem>>, vector<16x128xf32>
    %c0_2 = arith.constant 0 : index
    %c0_3 = arith.constant 0 : index
    %4 = vector.load %arg4[%c0_2, %c0_3] : memref<128x128xf32, #tpu.memory_space<vmem>>, vector<128x128xf32>
    %c0_4 = arith.constant 0 : index
    %c0_5 = arith.constant 0 : index
    %5 = vector.load %arg5[%c0_4, %c0_5] : memref<128x128xbf16, #tpu.memory_space<vmem>>, vector<128x128xbf16>
    %6 = arith.extf %5 : vector<128x128xbf16> to vector<128x128xf32>
    %7 = arith.mulf %4, %6 : vector<128x128xf32>
    %c0_6 = arith.constant 0 : index
    %c0_7 = arith.constant 0 : index
    %8 = vector.load %arg8[%c0_6, %c0_7] : memref<16x128xf32, #tpu.memory_space<vmem>>, vector<16x128xf32>
    %cst = arith.constant dense<0.000000e+00> : vector<16x128xf32>
    %9 = tpu.matmul %3, %7, %cst {dimension_numbers = #tpu.dot_dimension_numbers<[1], [0], [0], [1], [0, 0, 1, 1], [], []>} : vector<16x128xf32>, vector<128x128xf32>, vector<16x128xf32> -> vector<16x128xf32>
    %10 = arith.addf %8, %9 : vector<16x128xf32>
    %c0_8 = arith.constant 0 : index
    %c0_9 = arith.constant 0 : index
    %11 = vector.load %arg8[%c0_8, %c0_9] : memref<16x128xf32, #tpu.memory_space<vmem>>, vector<16x128xf32>
    tpu.vector_store %arg8[%c0_8, %c0_9], %10 {strides = array<i32>} : memref<16x128xf32, #tpu.memory_space<vmem>>, vector<16x128xf32>,
    %c2_i32 = arith.constant 2 : i32
    %12 = arith.cmpi eq, %arg2, %c2_i32 : i32
    %13 = arith.extui %12 : i1 to i32
    %c0_i32_10 = arith.constant 0 : i32
    %14 = arith.cmpi ne, %13, %c0_i32_10 : i32
    scf.if %14 {
      %c0_11 = arith.constant 0 : index
      %c0_12 = arith.constant 0 : index
      %15 = vector.load %arg8[%c0_11, %c0_12] : memref<16x128xf32, #tpu.memory_space<vmem>>, vector<16x128xf32>
      %c0_13 = arith.constant 0 : index
      %c0_14 = arith.constant 0 : index
      %16 = vector.load %arg6[%c0_13, %c0_14] : memref<1x128xf32, #tpu.memory_space<vmem>>, vector<1x128xf32>
      %17 = vector.broadcast %16 : vector<1x128xf32> to vector<16x128xf32>
      %18 = arith.addf %15, %17 : vector<16x128xf32>
      %cst_15 = arith.constant 0.000000e+00 : f32
      %19 = vector.broadcast %cst_15 : f32 to vector<16x128xf32>
      %20 = arith.maximumf %18, %19 : vector<16x128xf32>
      %c0_16 = arith.constant 0 : index
      %c0_17 = arith.constant 0 : index
      %21 = vector.load %arg7[%c0_16, %c0_17] : memref<16x128xf32, #tpu.memory_space<vmem>>, vector<16x128xf32>
      tpu.vector_store %arg7[%c0_16, %c0_17], %20 {strides = array<i32>} : memref<16x128xf32, #tpu.memory_space<vmem>>, vector<16x128xf32>,
    } else {
    }
    return
  }
  func.func @transform_0(%arg0: i32, %arg1: i32, %arg2: i32) -> (i32, i32) {
    %c0_i32 = arith.constant 0 : i32
    return %arg0, %arg2 : i32, i32
  }
  func.func @transform_1(%arg0: i32, %arg1: i32, %arg2: i32) -> (i32, i32) {
    %c0_i32 = arith.constant 0 : i32
    return %arg2, %arg1 : i32, i32
  }
  func.func @transform_2(%arg0: i32, %arg1: i32, %arg2: i32) -> (i32, i32) {
    %c0_i32 = arith.constant 0 : i32
    return %arg2, %arg1 : i32, i32
  }
  func.func @transform_3(%arg0: i32, %arg1: i32, %arg2: i32) -> (i32, i32) {
    %c0_i32 = arith.constant 0 : i32
    %c0_i32_0 = arith.constant 0 : i32
    return %c0_i32, %arg1 : i32, i32
  }
  func.func @transform_4(%arg0: i32, %arg1: i32, %arg2: i32) -> (i32, i32) {
    %c0_i32 = arith.constant 0 : i32
    return %arg0, %arg1 : i32, i32
  }
}

</mosaic_0001>

<bundles_post_ra>
// kernel: tpu_custom_call.1
= control target key start
LH: loop header
LB: loop body
LE: loop exit
PB: predicated region body
PF: predicated region fallthrough
CT: control target
= control target key end

     0   :  { %s1700_s0 = inlined_call_operand.hbm [shape: f32[16,384], index: 0, kind: input, shape index: {}]   ;;  %s1701_s1 = inlined_call_operand.hbm [shape: f32[384,384], index: 1, kind: input, shape index: {}]   ;;  %s1702_s2 = inlined_call_operand.hbm [shape: bf16[384,384], index: 2, kind: input, shape index: {}]   ;;  %s1703_s3 = inlined_call_operand.vmem [shape: f32[1,384], index: 3, kind: input, shape index: {}]   ;;  %s1704_s4 = inlined_call_operand.hbm [shape: f32[16,384], index: 4, kind: output, shape index: {}]  }
   0x1   :  { %1724 = sst [smem:[#allocation23_spill]] %s1701_s1 }
   0x2   :  { %1725 = sst [smem:[#allocation24_spill]] %s1703_s3 }
   0x3   :  { %1726 = sst [smem:[#allocation25_spill]] %s1704_s4 }
   0x4   :  { %9 = vsyncpa [#allocation4], 0 }
   0x5   :  { %11 = vsyncpa [#allocation4 + $0x1], 0 }
   0x6   :  { %12 = vsyncpa [#allocation7], 0 }
   0x7   :  { %14 = vsyncpa [#allocation7 + $0x1], 0 }
   0x8   :  { %15 = vsyncpa [#allocation5], 0 }
   0x9   :  { %17 = vsyncpa [#allocation5 + $0x1], 0  ;;  %s1258_s15 = smov 0   ;;  %s1260_s16 = smov 0  }
   0xa   :  { %s1262_s17 = smov 0   ;;  %s1264_s18 = smov 0  }
   0xb   :  { %s1266_s19 = smov 0   ;;  %s1268_s20 = smov 0  }
   0xc   :  { %s1270_s21 = smov 0   ;;  %s1272_s22 = smov 0  }
   0xd   :  { %s1274_s23 = smov 0   ;;  %s1276_s24 = smov 0  }
   0xe   :  { %s1278_s25 = smov 0   ;;  %s1280_s26 = smov 0  }
   0xf   :  { %s1282_s27 = smov 0   ;;  %s1284_s28 = smov 0  }
  0x10 LB: > { %1727 = sst [smem:[#allocation13_spill]] %s1165_s15  ;;  %s1327_s29 = sadd.s32 4294967295, %s1217_s28   ;;  %s1217_s28 = sphi %s1284_s28, %s23_s28   ;;  %s1213_s27 = sphi %s1282_s27, %s1788_s27   ;;  %s1209_s26 = sphi %s1280_s26, %s1787_s26   ;;  %s1205_s25 = sphi %s1278_s25, %s1786_s25   ;;  %s1201_s24 = sphi %s1276_s24, %s1785_s24   ;;  %s1197_s23 = sphi %s1274_s23, %s1784_s23   ;;  %s1193_s22 = sphi %s1272_s22, %s1783_s22   ;;  %s1189_s21 = sphi %s1270_s21, %s1782_s21   ;;  %s1185_s20 = sphi %s1268_s20, %s1781_s20   ;;  %s1181_s19 = sphi %s1266_s19, %s1780_s19   ;;  %s1177_s18 = sphi %s1264_s18, %s1779_s18   ;;  %s1173_s17 = sphi %s1262_s17, %s1770_s17   ;;  %s1169_s16 = sphi %s1260_s16, %s1778_s16   ;;  %s1165_s15 = sphi %s1258_s15, %s1777_s15  }
  0x11   : > { %1728 = sst [smem:[#allocation14_spill]] %s1173_s17  ;;  %s680_s30 = sadd.s32 4294967294, %s1217_s28  }
  0x12   : > { %1729 = sst [smem:[#allocation15_spill]] %s1201_s24  ;;  %s35_s5 = sadd.s32 1, %s1209_s26 }
  0x13   : > { %1730 = sst [smem:[#allocation16_spill]] %s1213_s27  ;;  %s38_s6 = sadd.s32 1, %s1213_s27 }
  0x14   : > { %p36_p0 = scmp.ge.s32.totalorder %s35_s5, 3  ;;  %p1714_p1 = scmp.eq.s32.totalorder %s1217_s28, 0 }
  0x15   : > { %p1713_p2 = scmp.eq.s32.totalorder %s1327_s29, 0  ;;  %s79_s7 = sadd.s32 1, %s1185_s20 }
  0x16   : > { %s1790_s5 = smov (%p36_p0, %s35_s5), 0  ;;  %s1792_s6 = smov (!%p36_p0, %s38_s6), %s1213_s27 }
  0x17   : > { %1731 = sst [smem:[#allocation17_spill]] %s1790_s5  ;;  %s1340_s8 = ssub.s32 %s1209_s26, %s1790_s5 }
  0x18   : > { %p86_p3 = scmp.ne.s32.totalorder %s1185_s20, %s1181_s19  ;;  %p40_p4 = scmp.ge.s32.totalorder %s1792_s6, 3 }
  0x19   : > { %p92_p7 = scmp.ne.s32.totalorder %s1181_s19, %s1177_s18  ;;  %s161_s11 = sadd.s32 1, %s1173_s17 }
  0x1a   : > { %p1347_p6 = por %p86_p3, %p1714_p1  ;;  %s1794_s6 = smov (%p40_p4, %s1792_s6), 0 }
  0x1b   : > { %1733 = sst [smem:[#allocation18_spill]] %s1794_s6  ;;  %p1356_p8 = por %p92_p7, %p1713_p2 }
  0x1c   : > { %s75_s12 = ssub.s32 %s1213_s27, %s1794_s6  ;;  %p171_p9 = scmp.ne.s32.totalorder %s1173_s17, %s1169_s16 }
  0x1d   : > { %s1734_s10 = scalar_select %p1356_p8, 1, 0 }
  0x1e   : > { %s76_s13 = sor.u32 %s75_s12, %s1340_s8  ;;  %p159_p10 = scmp.eq.s32.totalorder %s75_s12, 0 }
  0x1f   : > { %p77_p11 = scmp.eq.s32.totalorder %s76_s13, 0  ;;  %p172_p12 = scmp.eq.s32.totalorder %s1327_s29, 8 }
  0x20   : > { %s1368_s14 = scalar_select %p159_p10, %s1173_s17, %s161_s11  }
  0x21   : > { %s1371_s18 = scalar_select %p77_p11, %s1185_s20, %s79_s7  }
  0x22   : > { %1735 = sst [smem:[#allocation19_spill]] %s1368_s14  ;;  %p1373_p13 = por %p172_p12, %p171_p9 }
  0x23   : > { %1736 = sst [smem:[#allocation20_spill]] %s1371_s18  ;;  %p177_p0 = scmp.ne.s32.totalorder %s1169_s16, %s1165_s15 }
  0x24   : > { %s1737_s5 = scalar_select %p1373_p13, 1, 0 }
  0x25   : > { %p178_p3 = scmp.eq.s32.totalorder %s680_s30, 8  ;;  %p1712_p4 = scmp.lt.s32.totalorder %s1217_s28, 9 }
  0x26   : > { %1738 = sst [smem:[#allocation21_spill]] %s1737_s5  ;;  %s221_s4 = sand.u32 1, %s1217_s28  }
  0x27   : > { %p1380_p7 = por %p178_p3, %p177_p0  ;;  %s1710_s24 = sand.u32 1, %s1185_s20  }
  0x28   : > { %s685_s12 = sshll.u32 %s1710_s24, 7  ;;  %s829_s13 = smul.u32 48, %s1209_s26 }
  0x29   : > { %s1739_s6 = scalar_select %p1380_p7, 1, 0 }
  0x2a   : > { %p1393_p10 = pnand %p1712_p4, %p1347_p6  ;;  %s1398_s11 = sadd.s32 %s1213_s27, %s829_s13 }
  0x2b   : > { %1740 = sst [smem:[#allocation22_spill]] %s1739_s6  ;;  %s225_s30 = scalar_lea.vmem [#allocation6], %s685_s12 }
  0x2c   : > { %s234_s18 = sshll.u32 %s225_s30, 4  ;;  %s688_s14 = sshll.u32 %s1398_s11, 7  ;;  %s1401_s18 = int_to_ptr.vmem [resolvable:$true] %s234_s18 }
  0x2d   : > { %s1742_s1 = sld [smem:[#allocation23_spill]]  ;;  %s1408_s9 = scalar_lea.sflag [#allocation7], %s221_s4 }
  0x2e   : > { %p1721_p9 = pneg %p1393_p10 }
  0x33   : > { %s1406_s24 = scalar_lea.hbm %s1742_s1, %s688_s14  ;;  %s982_s17 = scalar_lea.hbm %s1742_s1, 18432 }
  0x34   : > { %s977_s15 = scalar_lea.hbm %s1406_s24, 2048  ;;  %p983_p0 = scmp.lt.u32.totalorder %s1406_s24, %s1742_s1 }
  0x35   : > { %p978_p6 = scmp.ne.s32.totalorder %s1406_s24, %s977_s15  ;;  %p984_p3 = scmp.lt.u32.totalorder %s982_s17, %s977_s15 }
  0x36   : > { %p986_p2 = scmp.lt.u32.totalorder %s977_s15, %s1406_s24 }
  0x37   : > { %p980_p11 = pnand %p1721_p9, %p978_p6  ;;  %p985_p4 = por %p984_p3, %p983_p0 }
  0x39   : > { %p981_p12 = pneg %p980_p11  ;;  %p987_p1 = por %p986_p2, %p985_p4 }
  0x3b   : > { %p988_p5 = pnand %p987_p1, %p981_p12 }
  0x3d   : > { %991 = shalt.err (!%p988_p5)
}
  0x3e   : > { %s992_s4 = scalar_lea.vmem %s1401_s18, 2048  ;;  %s1219_s30 = smov [#allocation6]  }
  0x3f   : > { %p993_p6 = scmp.ne.s32.totalorder %s1401_s18, %s992_s4  ;;  %s997_s12 = sshll.u32 %s1219_s30, 4  ;;  %s998_s12 = int_to_ptr.vmem [resolvable:$false] %s997_s12 }
  0x40   : > { %s999_s13 = scalar_lea.vmem %s998_s12, 4096  ;;  %p1000_p13 = scmp.lt.s32.totalorder %s1401_s18, %s998_s12 }
  0x41   : > { %p995_p11 = pnand %p993_p6, %p1721_p9  ;;  %p1001_p0 = scmp.lt.s32.totalorder %s999_s13, %s992_s4 }
  0x43   : > { %p996_p7 = pneg %p995_p11  ;;  %p1002_p3 = por %p1001_p0, %p1000_p13 }
  0x45   : > { %p1003_p2 = pnand %p1002_p3, %p996_p7 }
  0x47   : > { %1006 = shalt.err (!%p1003_p2)
}
  0x48   : > { %s1719_s15 = smov 384   ;;  %s1720_s17 = smov 128  }
  0x49   : > { %s1222_s6 = smov 8   ;;  %s1743_s14 = sand.u32 1, %s1185_s20  }
  0x4a   : > { %845 = dma.hbm_to_vmem [thread:$0]  (!%p1393_p10), %s1406_s24, 2048, %s1401_s18, %s1408_s9, %s1719_s15, %s1720_s17, %s1222_s6  }
  0x4b   : > { %s689_s4 = sshll.u32 %s1743_s14, 6  ;;  %s692_s30 = sshll.u32 %s1398_s11, 6 }
  0x4c   : > { %s1445_s1 = scalar_lea.hbm %s1702_s2, %s692_s30  ;;  %s248_s27 = scalar_lea.vmem [#allocation8], %s689_s4 }
  0x4d   : > { %s257_s5 = sshll.u32 %s248_s27, 4  ;;  %p693_p1 = scmp.ge.s32.totalorder %s1217_s28, 1  ;;  %s1448_s5 = int_to_ptr.vmem [resolvable:$true] %s257_s5 }
  0x4e   : > { %p271_p5 = scmp.lt.s32.totalorder %s1217_s28, 10  ;;  %s51_s24 = sadd.s32 1, %s1197_s23 }
  0x4f   : > { %p1745_p4 = scmp.eq.s32.totalorder %s1340_s8, 0  ;;  %p58_p7 = scmp.ne.s32.totalorder %s1197_s23, %s1193_s22 }
  0x50   : > { %p1451_p13 = pnand %p693_p1, %p271_p5  ;;  %p64_p12 = scmp.ne.s32.totalorder %s1193_s22, %s1189_s21 }
  0x51   : > { %s1459_s18 = scalar_select %p1745_p4, %s1197_s23, %s51_s24  }
  0x52   : > { %s1744_s3 = scalar_select %p1451_p13, 1, 0 }
  0x53   : > { %s198_s11 = sand.u32 1, %s1197_s23   ;;  %s684_s14 = sshll.u32 %s1209_s26, 7 }
  0x54   : > { %p1746_p6 = scmp.eq.s32.totalorder %s1217_s28, 0  ;;  %p1747_p0 = scmp.eq.s32.totalorder %s1327_s29, 0 }
  0x55   : > { %s683_s4 = sshll.u32 %s198_s11, 4  ;;  %s1478_s13 = scalar_lea.hbm %s1700_s0, %s684_s14 }
  0x56   : > { %p60_p11 = por %p1746_p6, %p58_p7  ;;  %p1471_p3 = por %p1747_p0, %p64_p12 }
  0x57   : > { %s202_s21 = scalar_lea.vmem [#allocation3], %s683_s4  ;;  %p1749_p2 = scmp.lt.s32.totalorder %s1217_s28, 9 }
  0x58   : > { %s1748_s27 = scalar_select %p1471_p3, 1, 0 }
  0x59   : > { %s211_s8 = sshll.u32 %s202_s21, 4  ;;  %p1482_p1 = pnand %p1749_p2, %p60_p11  ;;  %s1486_s8 = int_to_ptr.vmem [resolvable:$true] %s211_s8 }
  0x5a   : > { %s1488_s15 = scalar_lea.sflag [#allocation4], %s198_s11  ;;  %s1007_s30 = scalar_lea.hbm %s1478_s13, 256 }
  0x5b   : > { %p1008_p5 = scmp.ne.s32.totalorder %s1478_s13, %s1007_s30  ;;  %p1009_p4 = pneg %p1482_p1 }
  0x5c   : > { %s1012_s12 = scalar_lea.hbm %s1700_s0, 768  ;;  %p1013_p6 = scmp.lt.u32.totalorder %s1478_s13, %s1700_s0 }
  0x5d   : > { %p1010_p7 = pnand %p1009_p4, %p1008_p5  ;;  %p1014_p11 = scmp.lt.u32.totalorder %s1012_s12, %s1007_s30 }
  0x5e   : > { %p1016_p2 = scmp.lt.u32.totalorder %s1007_s30, %s1478_s13 }
  0x5f   : > { %p1011_p12 = pneg %p1010_p7  ;;  %p1015_p0 = por %p1014_p11, %p1013_p6 }
  0x61   : > { %p1017_p9 = por %p1016_p2, %p1015_p0 }
  0x63   : > { %p1018_p8 = pnand %p1017_p9, %p1011_p12 }
  0x65   : > { %1021 = shalt.err (!%p1018_p8)
}
  0x66   : > { %s1022_s11 = scalar_lea.vmem %s1486_s8, 256  ;;  %s1223_s14 = smov [#allocation3]  }
  0x67   : > { %p1023_p5 = scmp.ne.s32.totalorder %s1486_s8, %s1022_s11  ;;  %s1027_s4 = sshll.u32 %s1223_s14, 4  ;;  %s1028_s4 = int_to_ptr.vmem [resolvable:$false] %s1027_s4 }
  0x68   : > { %s1029_s17 = scalar_lea.vmem %s1028_s4, 512  ;;  %p1030_p13 = scmp.lt.s32.totalorder %s1486_s8, %s1028_s4 }
  0x69   : > { %p1025_p7 = pnand %p1023_p5, %p1009_p4  ;;  %p1031_p6 = scmp.lt.s32.totalorder %s1029_s17, %s1022_s11 }
  0x6b   : > { %p1026_p3 = pneg %p1025_p7  ;;  %p1032_p11 = por %p1031_p6, %p1030_p13 }
  0x6d   : > { %p1033_p0 = pnand %p1032_p11, %p1026_p3 }
  0x6f   : > { %1036 = shalt.err (!%p1033_p0)
}
  0x70   : > { %s1751_s30 = smov 128   ;;  %s1752_s12 = smov 384  }
  0x71   : > { %842 = dma.hbm_to_vmem [thread:$0]  (!%p1482_p1), %s1478_s13, 256, %s1486_s8, %s1488_s15, %s1752_s12, %s1751_s30, %s1222_s6  }
  0x72   : > { %s1037_s21 = scalar_lea.hbm %s1445_s1, 1024  ;;  %p1753_p9 = pneg %p1393_p10 }
  0x73   : > { %p1038_p8 = scmp.ne.s32.totalorder %s1445_s1, %s1037_s21  ;;  %s1042_s14 = scalar_lea.hbm %s1702_s2, 9216 }
  0x74   : > { %p1043_p4 = scmp.lt.u32.totalorder %s1445_s1, %s1702_s2  ;;  %p1044_p12 = scmp.lt.u32.totalorder %s1042_s14, %s1037_s21 }
  0x75   : > { %p1040_p13 = pnand %p1038_p8, %p1753_p9  ;;  %p1046_p5 = scmp.lt.u32.totalorder %s1037_s21, %s1445_s1 }
  0x76   : > { %p1045_p2 = por %p1044_p12, %p1043_p4 }
  0x77   : > { %p1041_p3 = pneg %p1040_p13 }
  0x78   : > { %p1047_p7 = por %p1046_p5, %p1045_p2 }
  0x7a   : > { %p1048_p6 = pnand %p1047_p7, %p1041_p3 }
  0x7c   : > { %1051 = shalt.err (!%p1048_p6)
}
  0x7d   : > { %s1052_s15 = scalar_lea.vmem %s1448_s5, 1024  ;;  %p1754_p11 = pmov %p1753_p9 }
  0x7e   : > { %p1053_p1 = scmp.ne.s32.totalorder %s1448_s5, %s1052_s15  ;;  %s1224_s6 = smov [#allocation8]  }
  0x7f   : > { %s1057_s13 = sshll.u32 %s1224_s6, 4  ;;  %s1058_s13 = int_to_ptr.vmem [resolvable:$false] %s1057_s13 }
  0x80   : > { %p1055_p0 = pnand %p1053_p1, %p1754_p11  ;;  %s1059_s8 = scalar_lea.vmem %s1058_s13, 2048 }
  0x81   : > { %p1060_p9 = scmp.lt.s32.totalorder %s1448_s5, %s1058_s13  ;;  %p1061_p13 = scmp.lt.s32.totalorder %s1059_s8, %s1052_s15 }
  0x82   : > { %p1056_p8 = pneg %p1055_p0 }
  0x83   : > { %p1062_p4 = por %p1061_p13, %p1060_p9 }
  0x85   : > { %p1063_p12 = pnand %p1062_p4, %p1056_p8 }
  0x87   : > { %1066 = shalt.err (!%p1063_p12)
}
  0x88   : > { %s1225_s30 = smov 192   ;;  %s1226_s12 = smov 64  }
  0x89   : > { %s1227_s21 = smov 4   ;;  %p1755_p3 = scmp.ne.s32.totalorder %s1744_s3, 0 }
  0x8a   : > { %848 = dma.hbm_to_vmem [thread:$0]  (!%p1393_p10), %s1445_s1, 1024, %s1448_s5, %s1408_s9, %s1225_s30, %s1226_s12, %s1227_s21  }
  0x8b   : > { %275 = sbr.rel (%p1755_p3) target bundleno = 468 (0x1d4), region = 36  ;;  %s277_s11 = sand.u32 (!%p1755_p3), 1, %s1193_s22  }
  0x8c   : > { %s1546_s24 = sshll.u32 (!%p1755_p3), %s277_s11, 4  ;;  %s278_s14 = scalar_lea.sflag (!%p1755_p3), [#allocation4], %s277_s11 }
  0x8d   : > { %s281_s4 = scalar_lea.vmem (!%p1755_p3), [#allocation3], %s1546_s24  ;;  %p1756_p2 = scmp.ne.s32.totalorder (!%p1755_p3), %s1748_s27, 0 }
  0x92   : > { %1152 = dma.done.wait (%p1756_p2), %s278_s14, 256  }
  0x93   : > { %1154 = vsyncadd (%p1756_p2), %s278_s14, 4294967040  ;;  %s286_s1 = sand.u32 1, %s1327_s29   ;;  %s288_s5 = sand.u32 1, %s1181_s19  }
  0x94   : > { %s695_s3 = sshll.u32 %s288_s5, 7  ;;  %s287_s7 = scalar_lea.sflag [#allocation7], %s286_s1 }
  0x95   : > { %s1555_s9 = scalar_lea.vmem [#allocation6], %s695_s3  ;;  %p1757_p10 = scmp.ne.s32.totalorder %s1734_s10, 0 }
  0x97   : > { %1156 = dma.done.wait (%p1757_p10), %s287_s7, 3072  }
  0x98   : > { %1158 = vsyncadd (%p1757_p10), %s287_s7, 4294964224  ;;  %s696_s27 = sshll.u32 %s288_s5, 6  ;;  %s334_s17 = sand.u32 1, %s1169_s16  }
  0x99   : > { %s697_s15 = sshll.u32 %s334_s17, 4  ;;  %p340_p5 = scmp.lt.s32.totalorder %s1205_s25, 2 }
  0x9a   : > { %s1758_s8 = sld [smem:[#allocation24_spill]]  ;;  %s1572_s12 = scalar_lea.vmem [#allocation8], %s696_s27 }
  0x9b   : > { %s1566_s29 = scalar_select %p340_p5, %s1205_s25, 2 }
  0x9c   : > { %s1574_s10 = scalar_lea.vmem [#allocation9], %s697_s15  ;;  %s1759_s21 = sld [smem:[#allocation15_spill]] }
  0xa0   : > { %s342_s30 = scalar_lea.vmem %s1758_s8, %s1566_s29 }
  0xa2   : > { %p698_p7 = scmp.ne.s32.totalorder %s1759_s21, 0 }
  0xa3   : > { %v1228_v0 = vmov (!%p698_p7), 0.0  }
  0xa4   : > { %347 = sbr.rel (%p698_p7) target bundleno = 171 (0xab), region = 52  ;;  %348 = vst [vmem:[#allocation2] sm:$0xff] (!%p698_p7), %v1228_v0  ;;  %349 = vst [vmem:[#allocation2 + $0x8] sm:$0xff] (!%p698_p7), %v1228_v0 }
  0xab PF: > { %v352_v1 = vld [vmem:[%s1555_s9] sm:$0xff]  ;;  %v353_v2 = vld [vmem:[%s1555_s9 + $0x8] sm:$0xff]  ;;  %v354_v6 = vld [vmem:[%s1555_s9 + $0x10] sm:$0xff]  ;;  %s1760_s11 = sld [smem:[#allocation15_spill]] }
  0xac   : > { %v706_v3 = vld [vmem:[%s1572_s12] sm:$0xff]   ;;  %v355_v7 = vld [vmem:[%s1555_s9 + $0x18] sm:$0xff]  ;;  %v737_v8 = vld [vmem:[%s1572_s12 + $0x8] sm:$0xff]  }
  0xad   : > { %v707_v4 = vunpack.c.l.bf16 %v706_v3  ;;  %v708_v5 = vunpack.c.h.bf16 %v706_v3  ;;  %v711_v9 = vunpack.c.l.bf16 %v737_v8  ;;  %v712_v10 = vunpack.c.h.bf16 %v737_v8  ;;  %v356_v11 = vld [vmem:[%s1555_s9 + $0x20] sm:$0xff]  ;;  %v357_v12 = vld [vmem:[%s1555_s9 + $0x28] sm:$0xff]  ;;  %v738_v13 = vld [vmem:[%s1572_s12 + $0x10] sm:$0xff]  }
  0xae   : > { %v715_v16 = vunpack.c.l.bf16 %v738_v13  ;;  %v716_v17 = vunpack.c.h.bf16 %v738_v13  ;;  %v739_v18 = vld [vmem:[%s1572_s12 + $0x18] sm:$0xff]   ;;  %v740_v26 = vld [vmem:[%s1572_s12 + $0x20] sm:$0xff]   ;;  %v358_v28 = vld [vmem:[%s1555_s9 + $0x30] sm:$0xff] }
  0xaf   : > { %v400_v14 = vmul.f32 %v707_v4, %v352_v1  ;;  %v401_v15 = vmul.f32 %v708_v5, %v353_v2  ;;  %v402_v19 = vmul.f32 %v711_v9, %v354_v6  ;;  %v403_v20 = vmul.f32 %v712_v10, %v355_v7  ;;  %v359_v29 = vld [vmem:[%s1555_s9 + $0x38] sm:$0xff]  ;;  %v350_v31 = vld [vmem:[%s281_s4] sm:$0xff]  ;;  %v361_v37 = vld [vmem:[%s1555_s9 + $0x48] sm:$0xff] }
  0xb0   : > { %v719_v21 = vunpack.c.l.bf16 %v739_v18  ;;  %v404_v23 = vmul.f32 %v715_v16, %v356_v11  ;;  %v405_v24 = vmul.f32 %v716_v17, %v357_v12  ;;  %v720_v25 = vunpack.c.h.bf16 %v739_v18  ;;  %v360_v35 = vld [vmem:[%s1555_s9 + $0x40] sm:$0xff]  ;;  %794 = vmatprep.mubr.f32.mxu0 %v350_v31  ;;  %v741_v38 = vld [vmem:[%s1572_s12 + $0x28] sm:$0xff]   ;;  %v742_v44 = vld [vmem:[%s1572_s12 + $0x30] sm:$0xff]  }
  0xb1   : > { %v797_v22 = vpack.c.bf16 %v401_v15, %v400_v14  ;;  %v801_v27 = vpack.c.bf16 %v403_v20, %v402_v19  ;;  %v723_v30 = vunpack.c.l.bf16 %v740_v26  ;;  %v724_v36 = vunpack.c.h.bf16 %v740_v26  ;;  %v362_v45 = vld [vmem:[%s1555_s9 + $0x50] sm:$0xff]  ;;  %v363_v46 = vld [vmem:[%s1555_s9 + $0x58] sm:$0xff]  ;;  %v364_v53 = vld [vmem:[%s1555_s9 + $0x60] sm:$0xff]  ;;  %p699_p6 = scmp.ne.s32.totalorder %s1760_s11, 2 }
  0xb2   : > { %v805_v32 = vpack.c.bf16 %v405_v24, %v404_v23  ;;  %v406_v33 = vmul.f32 %v719_v21, %v358_v28  ;;  %v407_v34 = vmul.f32 %v720_v25, %v359_v29  ;;  %v727_v42 = vunpack.c.l.bf16 %v741_v38  ;;  %v743_v52 = vld [vmem:[%s1572_s12 + $0x38] sm:$0xff]   ;;  %v365_v54 = vld [vmem:[%s1555_s9 + $0x68] sm:$0xff]  ;;  %v366_v60 = vld [vmem:[%s1555_s9 + $0x70] sm:$0xff] }
  0xb3   : > { %798 = vmatprep.subr.bf16.mxu0 %v797_v22  ;;  %v408_v39 = vmul.f32 %v723_v30, %v360_v35  ;;  %v409_v41 = vmul.f32 %v724_v36, %v361_v37  ;;  %v728_v43 = vunpack.c.h.bf16 %v741_v38  ;;  %v731_v47 = vunpack.c.l.bf16 %v742_v44  ;;  %v367_v61 = vld [vmem:[%s1555_s9 + $0x78] sm:$0xff]  ;;  %v416_v4 = vld [vmem:[#allocation2] sm:$0xff] }
  0xb4   : > { %800 = vmatpush3.bf16.msra.mxu0 %v797_v22  ;;  %v809_v40 = vpack.c.bf16 %v407_v34, %v406_v33  ;;  %v410_v49 = vmul.f32 %v727_v42, %v362_v45  ;;  %v732_v51 = vunpack.c.h.bf16 %v742_v44  ;;  %v735_v55 = vunpack.c.l.bf16 %v743_v52  ;;  %v351_v2 = vld [vmem:[%s281_s4 + $0x8] sm:$0xff]  ;;  %v700_v10 = vld [vmem:[%s342_s30] ss:$0 sm:$0xff] (!%p699_p6) }
  0xb5   : > { %802 = vmatprep.subr.bf16.mxu0 %v801_v27  ;;  %v813_v48 = vpack.c.bf16 %v409_v41, %v408_v39  ;;  %v411_v50 = vmul.f32 %v728_v43, %v363_v46  ;;  %v412_v57 = vmul.f32 %v731_v47, %v364_v53  ;;  %v736_v59 = vunpack.c.h.bf16 %v743_v52  ;;  %v417_v3 = vld [vmem:[#allocation2 + $0x8] sm:$0xff] }
  0xb6   : > { %v413_v58 = vmul.f32 %v732_v51, %v365_v54  ;;  %v414_v63 = vmul.f32 %v735_v55, %v366_v60 }
  0xb7   : > { %v817_v56 = vpack.c.bf16 %v411_v50, %v410_v49  ;;  %v415_v0 = vmul.f32 %v736_v59, %v367_v61 }
  0xb8   : > { %804 = vmatpush3.bf16.msra.mxu0 %v801_v27  ;;  %v821_v62 = vpack.c.bf16 %v413_v58, %v412_v57 }
  0xb9   : > { %806 = vmatprep.subr.bf16.mxu0 %v805_v32  ;;  %v825_v1 = vpack.c.bf16 %v415_v0, %v414_v63 }
  0xbc   : > { %808 = vmatpush3.bf16.msra.mxu0 %v805_v32 }
  0xbd   : > { %810 = vmatprep.subr.bf16.mxu0 %v809_v40 }
  0xc0   : > { %812 = vmatpush3.bf16.msra.mxu0 %v809_v40 }
  0xc1   : > { %814 = vmatprep.subr.bf16.mxu0 %v813_v48 }
  0xc4   : > { %816 = vmatpush3.bf16.msra.mxu0 %v813_v48 }
  0xc5   : > { %818 = vmatprep.subr.bf16.mxu0 %v817_v56 }
  0xc8   : > { %820 = vmatpush3.bf16.msra.mxu0 %v817_v56 }
  0xc9   : > { %822 = vmatprep.subr.bf16.mxu0 %v821_v62 }
  0xcc   : > { %824 = vmatpush3.bf16.msra.mxu0 %v821_v62 }
  0xcd   : > { %826 = vmatprep.subr.bf16.mxu0 %v825_v1 }
  0xd0   : > { %828 = vmatpush3.bf16.msra.mxu0 %v825_v1 }
  0xd3   : > { %795 = vmatmul.mubr.f32.vlgmr.msra.gmra.mrb[0].mxu0 %v351_v2 }
 0x1a4   : > { %500 = sbr.rel (%p699_p6) target bundleno = 439 (0x1b7), region = 56 }
 0x1a6   : > { %v796_v5 = vpop.f32.mrb[0].mxu0 }
 0x1a7   : > { %v494_v6 = vadd.f32 %v796_v5, %v417_v3  ;;  %v484_v7 = vpop.f32.mrb[1].mxu0 }
 0x1a8   : > { %v493_v8 = vadd.f32 %v484_v7, %v416_v4 }
 0x1a9   : > { %496 = vst [vmem:[#allocation2 + $0x8] sm:$0xff] %v494_v6 }
 0x1aa   : > { %495 = vst [vmem:[#allocation2] sm:$0xff] %v493_v8 }
 0x1b0   : > { %v502_v11 = vld [vmem:[#allocation2 + $0x8] sm:$0xff] }
 0x1b1   : > { %v501_v9 = vld [vmem:[#allocation2] sm:$0xff]  ;;  %v511_v13 = vadd.f32 %v700_v10, %v502_v11 }
 0x1b2   : > { %v510_v12 = vadd.f32 %v700_v10, %v501_v9 }
 0x1b3   : > { %v513_v15 = vmax.f32 %v511_v13, 0.0 }
 0x1b4   : > { %v512_v14 = vmax.f32 %v510_v12, 0.0 }
 0x1b5   : > { %515 = vst [vmem:[%s1574_s10 + $0x8] sm:$0xff] %v513_v15 }
 0x1b6   : > { %514 = vst [vmem:[%s1574_s10] sm:$0xff] %v512_v14 }
 0x1b7 PF: > { %s1762_s24 = sld [smem:[#allocation21_spill]]  ;;  %s702_s4 = sshll.u32 %s1205_s25, 7 }
 0x1b8   : > { %s1763_s9 = sld [smem:[#allocation25_spill]]  ;;  %s532_s15 = sshll.u32 %s1574_s10, 4  ;;  %s1620_s15 = int_to_ptr.vmem [resolvable:$true] %s532_s15 }
 0x1b9   : > { %s1624_s29 = scalar_lea.sflag [#allocation5], %s334_s17  ;;  %s1067_s6 = scalar_lea.vmem %s1620_s15, 256 }
 0x1ba   : > { %p1068_p1 = scmp.ne.s32.totalorder %s1620_s15, %s1067_s6  ;;  %s1229_s25 = smov [#allocation9]  }
 0x1bb   : > { %s1071_s13 = sshll.u32 %s1229_s25, 4  ;;  %s1072_s13 = int_to_ptr.vmem [resolvable:$false] %s1071_s13 }
 0x1bc   : > { %s1073_s8 = scalar_lea.vmem %s1072_s13, 512  ;;  %p1074_p9 = scmp.lt.s32.totalorder %s1620_s15, %s1072_s13 }
 0x1bd   : > { %p1764_p11 = scmp.ne.s32.totalorder %s1762_s24, 0  ;;  %p1075_p13 = scmp.lt.s32.totalorder %s1073_s8, %s1067_s6 }
 0x1be   : > { %s1617_s27 = scalar_lea.hbm %s1763_s9, %s702_s4 }
 0x1bf   : > { %p1069_p0 = pnand %p1068_p1, %p1764_p11  ;;  %p1076_p4 = por %p1075_p13, %p1074_p9 }
 0x1c1   : > { %p1070_p8 = pneg %p1069_p0 }
 0x1c3   : > { %p1077_p12 = pnand %p1076_p4, %p1070_p8 }
 0x1c5   : > { %1080 = shalt.err (!%p1077_p12)
}
 0x1c6   : > { %s1081_s17 = scalar_lea.hbm %s1617_s27, 256  ;;  %s1085_s10 = scalar_lea.hbm %s1763_s9, 768 }
 0x1c7   : > { %p1082_p3 = scmp.ne.s32.totalorder %s1617_s27, %s1081_s17  ;;  %p1086_p5 = scmp.lt.u32.totalorder %s1617_s27, %s1763_s9 }
 0x1c8   : > { %p1087_p7 = scmp.lt.u32.totalorder %s1085_s10, %s1081_s17  ;;  %p1089_p1 = scmp.lt.u32.totalorder %s1081_s17, %s1617_s27 }
 0x1c9   : > { %p1083_p2 = pnand %p1082_p3, %p1764_p11 }
 0x1ca   : > { %p1088_p6 = por %p1087_p7, %p1086_p5 }
 0x1cb   : > { %p1084_p10 = pneg %p1083_p2 }
 0x1cc   : > { %p1090_p0 = por %p1089_p1, %p1088_p6 }
 0x1ce   : > { %p1091_p8 = pnand %p1090_p0, %p1084_p10 }
 0x1d0   : > { %1094 = shalt.err (!%p1091_p8)
}
 0x1d1   : > { %s1230_s14 = smov 128   ;;  %s1231_s1 = smov 384  }
 0x1d2   : > { %s1232_s5 = smov 8  }
 0x1d3   : > { %837 = dma.vmem_to_hbm [thread:$0]  (%p1764_p11), %s1620_s15, 256, %s1617_s27, %s1624_s29, %s1230_s14, %s1231_s1, %s1232_s5  }
 0x1d4 PF: > { %s1765_s4 = sld [smem:[#allocation13_spill]]  ;;  %s1766_s3 = sld [smem:[#allocation22_spill]] }
 0x1d5   : > { %p854_p9 = scmp.ge.s32.totalorder %s1217_s28, 2 }
 0x1da   : > { %s547_s7 = sand.u32 1, %s1765_s4   ;;  %p1767_p13 = scmp.ne.s32.totalorder %s1766_s3, 0 }
 0x1db   : > { %s548_s6 = scalar_lea.sflag [#allocation5], %s547_s7 }
 0x1dc   : > { %p850_p4 = pnand %p854_p9, %p1767_p13 }
 0x1de   : > { %1160 = dma.done.wait (!%p850_p4), %s548_s6, 256  }
 0x1df   : > { %1162 = vsyncadd (!%p850_p4), %s548_s6, 4294967040  ;;  %s23_s28 = sadd.s32 1, %s1217_s28   ;;  %s1769_s24 = sld [smem:[#allocation14_spill]] }
 0x1e0   : > { %p1653_p12 = scmp.ge.s32.totalorder %s23_s28, 11   ;;  %s1770_s17 = sld [smem:[#allocation19_spill]] }
 0x1e1   : > { %s1771_s27 = sld [smem:[#allocation20_spill]]  ;;  %s1772_s29 = smov %s1459_s18 }
 0x1e2   : > { %s1773_s13 = sld [smem:[#allocation16_spill]]  ;;  %s1774_s8 = sld [smem:[#allocation17_spill]] }
 0x1e3   : > { %s1775_s30 = sld [smem:[#allocation18_spill]]  ;;  %s1777_s15 = smov %s1169_s16 }
 0x1e4   : > { %s1779_s18 = smov %s1181_s19  ;;  %s1780_s19 = smov %s1185_s20 }
 0x1e5   : > { %s1778_s16 = smov %s1769_s24  ;;  %s1782_s21 = smov %s1193_s22 }
 0x1e6   : > { %s1783_s22 = smov %s1197_s23  ;;  %s1784_s23 = smov %s1772_s29 }
 0x1e7   : > { %s1781_s20 = smov %s1771_s27  ;;  %s1785_s24 = smov %s1209_s26 }
 0x1e8   : > { %s1786_s25 = smov %s1773_s13  ;;  %s1787_s26 = smov %s1774_s8 }
 0x1e9   : > { %s1788_s27 = smov %s1775_s30  ;;  %22 = sbr.rel (!%p1653_p12) target bundleno = 16 (0x10), region = 116 }
 0x1f0   :  { %553 = vsyncpa [#allocation4], 1 }
 0x1f1   :  { %555 = vsyncpa [#allocation4 + $0x1], 1 }
 0x1f2   :  { %556 = vsyncpa [#allocation7], 1 }
 0x1f3   :  { %558 = vsyncpa [#allocation7 + $0x1], 1 }
 0x1f4   :  { %559 = vsyncpa [#allocation5], 1 }
 0x1f5   :  { %561 = vsyncpa [#allocation5 + $0x1], 1 }

</bundles_post_ra>
